<compile_context>
chip_gen: v7x
topology: tpu7x:2x2x1
jax: 0.10.0
libtpu: 0.0.40
codegen_flags: <defaults>
</compile_context>

<pallas_src>
import jax
import jax.numpy as jnp
from jax import lax
from jax.experimental import pallas as pl
from jax.experimental.pallas import tpu as pltpu


def _largest_divisor_leq(n, cap):
    for t in range(min(n, cap), 0, -1):
        if n % t == 0:
            return t
    return 1


def _make_wsconv2d_kernel(K, tH, Wo, Cin, tCout, out_dtype):
    """Per-(batch, Cout-tile, row-tile) kernel; shapes baked in as Python consts."""

    def kernel(x_ref, w_ref, b_ref, o_ref):
        # x_ref: (1, tH+K-1, Wp, Cin)   halo'd input row slab (native dtype, VMEM)
        # w_ref: (K*K*Cin, tCout)       scale-folded weights (resident across h sweep)
        # b_ref: (1, tCout)             f32 bias tile (resident across h sweep)
        # o_ref: (1, tH, Wo, tCout)     lane-dense output tile
        x = x_ref[0]                                     # (tH+K-1, Wp, Cin)

        # im2col in VMEM: one (tH*Wo, K*K*Cin) patch, ordering (ky, kx, cin)
        # matches the host-side weight reshape.
        cols = []
        for ky in range(K):
            for kx in range(K):
                cols.append(x[ky:ky + tH, kx:kx + Wo, :].reshape(tH * Wo, Cin))
        patch = jnp.concatenate(cols, axis=1)            # (tH*Wo, K*K*Cin)

        # Single deep MXU contraction, f32 accumulation.
        acc = jnp.dot(patch, w_ref[...], preferred_element_type=jnp.float32)
        out = acc + b_ref[...]                           # broadcast (1, tCout)
        o_ref[0] = out.reshape(tH, Wo, tCout).astype(out_dtype)

    return kernel


def wsconv2d_pallas(x_nchw, w_oihw, bias, *, stride=1, padding=1):
    """WSConv2d forward.  x: (B, Cin, H, W); w: (Cout, Cin, K, K); bias: (Cout,)."""
    B, Cin, H, W = x_nchw.shape
    Cout, Cin_w, K, K2 = w_oihw.shape
    assert Cin_w == Cin and K == K2
    # TODO(synk): stride > 1 needs strided output tiling; module default (stride=1) only.
    assert stride == 1, "only stride=1 (the module default) is implemented"

    scale = float((2.0 / (Cin * K * K)) ** 0.5)
    Ho = H + 2 * padding - K + 1
    Wo = W + 2 * padding - K + 1
    Hp, Wp = H + 2 * padding, W + 2 * padding

    # ---- tiling ----
    tH = _largest_divisor_leq(Ho, 8)           # 8-16 output rows per step is the sweet spot
    nH = Ho // tH
    LANES = 128
    Cout_p = ((Cout + LANES - 1) // LANES) * LANES   # lane-dense output channels
    tCout = 128                                # TODO(synk): bump to 256 on v6e/v7x MXUs.
    nC = Cout_p // tCout

    # ---- host-side prep ----
    # NCHW -> NHWC (lane-dense channels), zero-pad spatial dims once.
    # TODO(synk): keep NHWC end-to-end and handle the 1-px halo in-kernel (manual DMA)
    # to remove this HBM-level pad/transpose round trip if the surrounding graph allows.
    x_nhwc = jnp.transpose(x_nchw, (0, 2, 3, 1))
    x_pad = jnp.pad(x_nhwc, ((0, 0), (padding, padding), (padding, padding), (0, 0)))

    # Overlapping row slabs (halo = K-1 rows) so BlockSpecs stay non-overlapping and
    # the auto-pipeliner can double-buffer the activation stream.
    row_idx = (jnp.arange(nH)[:, None] * tH + jnp.arange(tH + K - 1)[None, :]).reshape(-1)
    x_slabs = jnp.take(x_pad, row_idx, axis=1).reshape(B * nH, tH + K - 1, Wp, Cin)

    # Fold the WS scale into the weights; lay out as an MXU-ready (K*K*Cin, Cout_p)
    # matrix in the input's native dtype.  Zero-pad Cout for lane-dense stores.
    w_mat = (jnp.transpose(w_oihw, (2, 3, 1, 0)) * scale).reshape(K * K * Cin, Cout)
    w_mat = jnp.pad(w_mat, ((0, 0), (0, Cout_p - Cout))).astype(x_nchw.dtype)
    b_pad = jnp.pad(bias.astype(jnp.float32), (0, Cout_p - Cout)).reshape(1, Cout_p)

    kernel = _make_wsconv2d_kernel(K, tH, Wo, Cin, tCout, x_nchw.dtype)

    # Explicit VMEM budget with headroom (double-buffered blocks), capped below the
    # v7x 64 MiB physical limit so the same tiling runs on every chip.
    itm = x_nchw.dtype.itemsize
    blk_bytes = ((tH + K - 1) * Wp * Cin * itm        # x slab
                 + K * K * Cin * tCout * itm          # weight tile
                 + tCout * 4                          # bias tile
                 + tH * Wo * tCout * itm)             # output tile
    vmem_limit = int(min(64 * 2 ** 20, max(32 * 2 ** 20, 4 * blk_bytes)))

    out_nhwc = pl.pallas_call(
        kernel,
        out_shape=jax.ShapeDtypeStruct((B, Ho, Wo, Cout_p), x_nchw.dtype),
        grid_spec=pltpu.PrefetchScalarGridSpec(
            num_scalar_prefetch=0,
            grid=(B, nC, nH),                              # h innermost: stream activations,
            in_specs=[                                     # keep the weight tile resident.
                pl.BlockSpec((1, tH + K - 1, Wp, Cin),
                             lambda b, c, h: (b * nH + h, 0, 0, 0)),
                # TODO(synk): single-buffer these resident blocks (pipeline_mode=Buffered(1))
                # once that knob is available in this pipeline, to reclaim VMEM at large Cin.
                pl.BlockSpec((K * K * Cin, tCout), lambda b, c, h: (0, c)),
                pl.BlockSpec((1, tCout), lambda b, c, h: (0, c)),
            ],
            out_specs=pl.BlockSpec((1, tH, Wo, tCout), lambda b, c, h: (b, h, 0, c)),
        ),
        compiler_params=pltpu.CompilerParams(
            dimension_semantics=("parallel", "parallel", "parallel"),
            vmem_limit_bytes=vmem_limit),
    )(x_slabs, w_mat, b_pad)

    out_nhwc = out_nhwc[..., :Cout]            # drop lane padding
    # TODO(synk): keep NHWC end-to-end if the surrounding graph allows.
    return jnp.transpose(out_nhwc, (0, 3, 1, 2))


def _reference(x_nchw, w_oihw, bias, *, stride=1, padding=1):
    """Pure-JAX replica of the PyTorch WSConv2d forward (for verification)."""
    Cin = x_nchw.shape[1]
    K = w_oihw.shape[2]
    scale = (2.0 / (Cin * K * K)) ** 0.5
    out = lax.conv_general_dilated(
        x_nchw * scale, w_oihw,
        window_strides=(stride, stride),
        padding=((padding, padding), (padding, padding)),
        dimension_numbers=("NCHW", "OIHW", "NCHW"))
    return out + bias.reshape(1, -1, 1, 1)


if __name__ == "__main__":
    # Small shapes consistent with the module: 3x3 conv, stride 1, padding 1.
    B, Cin, H, W = 2, 8, 16, 16
    Cout, K = 16, 3

    key = jax.random.PRNGKey(0)
    kx, kw, kb = jax.random.split(key, 3)

    x = jax.random.normal(kx, (B, Cin, H, W), dtype=jnp.float32)
    # nn.init.normal_ on the conv weight.
    w = jax.random.normal(kw, (Cout, Cin, K, K), dtype=jnp.float32)
    # The module zero-inits the bias; use a small nonzero bias so the add path is exercised.
    b = 0.1 * jax.random.normal(kb, (Cout,), dtype=jnp.float32)

    out = wsconv2d_pallas(x, w, b, stride=1, padding=1)
    out = jax.block_until_ready(out)

    ref = _reference(x, w, b, stride=1, padding=1)
    assert out.shape == ref.shape == (B, Cout, H, W)
    assert jnp.allclose(out, ref, atol=1e-4, rtol=1e-4), "mismatch vs reference"

    print("KERNEL_OK")
</pallas_src>

<mosaic_0001>
module attributes {stable_mosaic.version = 11 : i64} {
  func.func @kernel(%arg0: i32, %arg1: i32, %arg2: i32, %arg3: memref<1x10x18x8xf32, #tpu.memory_space<vmem>>, %arg4: memref<72x128xf32, #tpu.memory_space<vmem>>, %arg5: memref<1x128xf32, #tpu.memory_space<vmem>>, %arg6: memref<1x8x16x128xf32, #tpu.memory_space<vmem>>) attributes {dimension_semantics = [#tpu.dimension_semantics<parallel>, #tpu.dimension_semantics<parallel>, #tpu.dimension_semantics<parallel>], iteration_bounds = array<i64: 2, 1, 2>, scalar_prefetch = 0 : i64, scratch_operands = 0 : i64, tpu.core_type = #tpu.core_type<tc>, window_params = [{transform_indices = @transform_0, window_bounds = array<i64: 1, 10, 18, 8>}, {transform_indices = @transform_1, window_bounds = array<i64: 72, 128>}, {transform_indices = @transform_2, window_bounds = array<i64: 1, 128>}, {transform_indices = @transform_3, window_bounds = array<i64: 1, 8, 16, 128>}]} {
    %c0 = arith.constant 0 : index
    %c0_0 = arith.constant 0 : index
    %c0_1 = arith.constant 0 : index
    %c0_2 = arith.constant 0 : index
    %0 = vector.load %arg3[%c0, %c0_0, %c0_1, %c0_2] : memref<1x10x18x8xf32, #tpu.memory_space<vmem>>, vector<1x10x18x8xf32>
    %1 = vector.shape_cast %0 : vector<1x10x18x8xf32> to vector<10x18x8xf32>
    %2 = vector.extract_strided_slice %1 {offsets = [0, 0, 0], sizes = [8, 16, 8], strides = [1, 1, 1]} : vector<10x18x8xf32> to vector<8x16x8xf32>
    %3 = vector.shape_cast %2 : vector<8x16x8xf32> to vector<128x8xf32>
    %4 = vector.extract_strided_slice %1 {offsets = [0, 1, 0], sizes = [8, 16, 8], strides = [1, 1, 1]} : vector<10x18x8xf32> to vector<8x16x8xf32>
    %5 = vector.shape_cast %4 : vector<8x16x8xf32> to vector<128x8xf32>
    %6 = vector.extract_strided_slice %1 {offsets = [0, 2, 0], sizes = [8, 16, 8], strides = [1, 1, 1]} : vector<10x18x8xf32> to vector<8x16x8xf32>
    %7 = vector.shape_cast %6 : vector<8x16x8xf32> to vector<128x8xf32>
    %8 = vector.extract_strided_slice %1 {offsets = [1, 0, 0], sizes = [8, 16, 8], strides = [1, 1, 1]} : vector<10x18x8xf32> to vector<8x16x8xf32>
    %9 = vector.shape_cast %8 : vector<8x16x8xf32> to vector<128x8xf32>
    %10 = vector.extract_strided_slice %1 {offsets = [1, 1, 0], sizes = [8, 16, 8], strides = [1, 1, 1]} : vector<10x18x8xf32> to vector<8x16x8xf32>
    %11 = vector.shape_cast %10 : vector<8x16x8xf32> to vector<128x8xf32>
    %12 = vector.extract_strided_slice %1 {offsets = [1, 2, 0], sizes = [8, 16, 8], strides = [1, 1, 1]} : vector<10x18x8xf32> to vector<8x16x8xf32>
    %13 = vector.shape_cast %12 : vector<8x16x8xf32> to vector<128x8xf32>
    %14 = vector.extract_strided_slice %1 {offsets = [2, 0, 0], sizes = [8, 16, 8], strides = [1, 1, 1]} : vector<10x18x8xf32> to vector<8x16x8xf32>
    %15 = vector.shape_cast %14 : vector<8x16x8xf32> to vector<128x8xf32>
    %16 = vector.extract_strided_slice %1 {offsets = [2, 1, 0], sizes = [8, 16, 8], strides = [1, 1, 1]} : vector<10x18x8xf32> to vector<8x16x8xf32>
    %17 = vector.shape_cast %16 : vector<8x16x8xf32> to vector<128x8xf32>
    %18 = vector.extract_strided_slice %1 {offsets = [2, 2, 0], sizes = [8, 16, 8], strides = [1, 1, 1]} : vector<10x18x8xf32> to vector<8x16x8xf32>
    %19 = vector.shape_cast %18 : vector<8x16x8xf32> to vector<128x8xf32>
    %20 = tpu.concatenate %3, %5, %7, %9, %11, %13, %15, %17, %19 in 1 : vector<128x8xf32>, vector<128x8xf32>, vector<128x8xf32>, vector<128x8xf32>, vector<128x8xf32>, vector<128x8xf32>, vector<128x8xf32>, vector<128x8xf32>, vector<128x8xf32> -> vector<128x72xf32>
    %c0_3 = arith.constant 0 : index
    %c0_4 = arith.constant 0 : index
    %21 = vector.load %arg4[%c0_3, %c0_4] : memref<72x128xf32, #tpu.memory_space<vmem>>, vector<72x128xf32>
    %cst = arith.constant dense<0.000000e+00> : vector<128x128xf32>
    %22 = tpu.matmul %20, %21, %cst {dimension_numbers = #tpu.dot_dimension_numbers<[1], [0], [0], [1], [0, 0, 1, 1], [], []>} : vector<128x72xf32>, vector<72x128xf32>, vector<128x128xf32> -> vector<128x128xf32>
    %c0_5 = arith.constant 0 : index
    %c0_6 = arith.constant 0 : index
    %23 = vector.load %arg5[%c0_5, %c0_6] : memref<1x128xf32, #tpu.memory_space<vmem>>, vector<1x128xf32>
    %24 = vector.broadcast %23 : vector<1x128xf32> to vector<128x128xf32>
    %25 = arith.addf %22, %24 : vector<128x128xf32>
    %26 = vector.shape_cast %25 : vector<128x128xf32> to vector<8x16x128xf32>
    %c0_7 = arith.constant 0 : index
    %c0_8 = arith.constant 0 : index
    %c0_9 = arith.constant 0 : index
    %c0_10 = arith.constant 0 : index
    %27 = vector.load %arg6[%c0_7, %c0_8, %c0_9, %c0_10] : memref<1x8x16x128xf32, #tpu.memory_space<vmem>>, vector<1x8x16x128xf32>
    %28 = vector.shape_cast %27 : vector<1x8x16x128xf32> to vector<8x16x128xf32>
    %29 = vector.shape_cast %26 : vector<8x16x128xf32> to vector<1x8x16x128xf32>
    tpu.vector_store %arg6[%c0_7, %c0_8, %c0_9, %c0_10], %29 {strides = array<i32>} : memref<1x8x16x128xf32, #tpu.memory_space<vmem>>, vector<1x8x16x128xf32>,
    return
  }
  func.func @transform_0(%arg0: i32, %arg1: i32, %arg2: i32) -> (i32, i32, i32, i32) {
    %c2_i32 = arith.constant 2 : i32
    %0 = arith.muli %arg0, %c2_i32 : i32
    %1 = arith.addi %0, %arg2 : i32
    %c0_i32 = arith.constant 0 : i32
    %c0_i32_0 = arith.constant 0 : i32
    %c0_i32_1 = arith.constant 0 : i32
    %c0_i32_2 = arith.constant 0 : i32
    return %1, %c0_i32, %c0_i32_0, %c0_i32_1 : i32, i32, i32, i32
  }
  func.func @transform_1(%arg0: i32, %arg1: i32, %arg2: i32) -> (i32, i32) {
    %c0_i32 = arith.constant 0 : i32
    %c0_i32_0 = arith.constant 0 : i32
    return %c0_i32, %arg1 : i32, i32
  }
  func.func @transform_2(%arg0: i32, %arg1: i32, %arg2: i32) -> (i32, i32) {
    %c0_i32 = arith.constant 0 : i32
    %c0_i32_0 = arith.constant 0 : i32
    return %c0_i32, %arg1 : i32, i32
  }
  func.func @transform_3(%arg0: i32, %arg1: i32, %arg2: i32) -> (i32, i32, i32, i32) {
    %c0_i32 = arith.constant 0 : i32
    %c0_i32_0 = arith.constant 0 : i32
    return %arg0, %arg2, %c0_i32, %arg1 : i32, i32, i32, i32
  }
}

</mosaic_0001>

<bundles_post_ra>
// kernel: tpu_custom_call.1
= control target key start
LH: loop header
LB: loop body
LE: loop exit
PB: predicated region body
PF: predicated region fallthrough
CT: control target
= control target key end

     0   :  { %8 = vsyncpa [#allocation3], 0  ;;  %s2428_s0 = inlined_call_operand.vmem [shape: f32[4,10,18,8], index: 0, kind: input, shape index: {}]   ;;  %s2429_s1 = inlined_call_operand.vmem [shape: f32[72,128], index: 1, kind: input, shape index: {}]   ;;  %s2430_s2 = inlined_call_operand.vmem [shape: f32[1,128], index: 2, kind: input, shape index: {}]   ;;  %s2431_s3 = inlined_call_operand.hbm [shape: f32[2,16,16,128], index: 3, kind: output, shape index: {}]  }
   0x1   :  { %10 = vsyncpa [#allocation3 + $0x1], 0  ;;  %s1608_s12 = smov 0   ;;  %s1610_s13 = smov 0  }
   0x2   :  { %s1612_s14 = smov 0   ;;  %s1614_s15 = smov 0  }
   0x3   :  { %s1616_s16 = smov 0   ;;  %s1618_s17 = smov 0  }
   0x4   :  { %s1620_s18 = smov 0   ;;  %s1622_s19 = smov 0  }
   0x5 LB: > { %s1271_s20 = sadd.s32 4294967295, %s1576_s19   ;;  %s1272_s21 = sadd.s32 4294967294, %s1576_s19   ;;  %s1576_s19 = sphi %s1622_s19, %s16_s19   ;;  %s1572_s18 = sphi %s1620_s18, %s2467_s18   ;;  %s1568_s17 = sphi %s1618_s17, %s2466_s17   ;;  %s1564_s16 = sphi %s1616_s16, %s2465_s16   ;;  %s1560_s15 = sphi %s1614_s15, %s2464_s15   ;;  %s1556_s14 = sphi %s1612_s14, %s2463_s14   ;;  %s1552_s13 = sphi %s1610_s13, %s2462_s13   ;;  %s1548_s12 = sphi %s1608_s12, %s2461_s12  }
   0x6   : > { %s28_s22 = sadd.s32 1, %s1568_s17  ;;  %s35_s23 = sadd.s32 1, %s1572_s18 }
   0x7   : > { %p29_p0 = scmp.ge.s32.totalorder %s28_s22, 2  ;;  %p138_p1 = scmp.ne.s32.totalorder %s1556_s14, %s1552_s13 }
   0x8   : > { %p139_p2 = scmp.eq.s32.totalorder %s1271_s20, 3  ;;  %p144_p5 = scmp.ne.s32.totalorder %s1552_s13, %s1548_s12 }
   0x9   : > { %s2469_s22 = smov (%p29_p0, %s28_s22), 0  ;;  %s2471_s23 = smov (!%p29_p0, %s35_s23), %s1572_s18 }
   0xa   : > { %s122_s24 = ssub.s32 %s1568_s17, %s2469_s22  ;;  %p1659_p3 = por %p139_p2, %p138_p1 }
   0xb   : > { %p37_p4 = scmp.ge.s32.totalorder %s2471_s23, 2  ;;  %p145_p6 = scmp.eq.s32.totalorder %s1272_s21, 3 }
   0xc   : > { %p1279_p7 = scmp.ge.s32.totalorder %s1576_s19, 1  ;;  %p188_p9 = scmp.lt.s32.totalorder %s1576_s19, 5 }
   0xd   : > { %s2473_s23 = smov (%p37_p4, %s2471_s23), 0  ;;  %p1668_p8 = por %p145_p6, %p144_p5 }
   0xe   : > { %s121_s27 = ssub.s32 %s1572_s18, %s2473_s23  ;;  %s128_s28 = sadd.s32 1, %s1556_s14 }
   0xf   : > { %s123_s29 = sor.u32 %s122_s24, %s121_s27  ;;  %p189_p10 = pnand %p1279_p7, %p188_p9 }
  0x10   : > { %p126_p11 = scmp.eq.s32.totalorder %s123_s29, 0 }
  0x11   : > { %192 = sbr.rel (%p189_p10) target bundleno = 635 (0x27b), region = 32 }
  0x12   : > { %s1677_s30 = scalar_select %p126_p11, %s1556_s14, %s128_s28  }
  0x18   : > { %s1281_s4 = sshll.u32 %s1564_s16, 1  ;;  %vm292_vm0 = vcmask 1046528   ;;  %s1578_s10 = smov 8   ;;  %vm333_vm1 = vcmask 1045504   ;;  %v920_v62 = vld [vmem:[%s2429_s1] sm:$0xff]  ;;  %v921_v63 = vld [vmem:[%s2429_s1 + $0x8] sm:$0xff] }
  0x19   : > { %s222_s5 = sadd.s32 %s1560_s15, %s1281_s4  ;;  %s1579_s11 = smov 16   ;;  %vm784_vm2 = vcmask 64512   ;;  %vm801_vm3 = vcmask 130048   ;;  %vm818_vm4 = vcmask 195584   ;;  %vm835_vm5 = vcmask 261120  }
  0x1a   : > { %p223_p12 = scmp.lt.s32.totalorder %s222_s5, 3  ;;  %s1580_s20 = smov 24   ;;  %vm852_vm6 = vcmask 326656   ;;  %vm869_vm7 = vcmask 392192   ;;  %vm886_vm8 = vcmask 457728   ;;  %vm903_vm9 = vcmask 523264  }
  0x1b   : > { %s1581_s21 = smov 32   ;;  %s1582_s24 = smov 40   ;;  %vm936_vm10 = vcmask 588800  }
  0x1c   : > { %s2475_s5 = smov (!%p223_p12, %s222_s5), 3  ;;  %s1583_s27 = smov 48  }
  0x1d   : > { %s1401_s6 = smul.u32 240, %s2475_s5  ;;  %s1585_s7 = smov 64  }
  0x1f   : > { %s1684_s9 = scalar_lea.vmem %s2428_s0, %s1401_s6  ;;  %s1584_s6 = smov 56  }
  0x20   : > { %v1687_v0 = vld [vmem:[%s1684_s9 + $0x8] sm:$0xff]  ;;  %v240_v1 = vld [vmem:[%s1684_s9 + $0x10] sm:$0x3]  ;;  %v1691_v2 = vld [vmem:[%s1684_s9] sm:$0xff] }
  0x21   : > { %v294_v3 = vrot.slane %v1687_v0, 1  ;;  %v296_v4 = vrot.slane %v240_v1, 1  ;;  %v293_v5 = vrot.slane %v1691_v2, 1  ;;  %v1696_v6 = vld [vmem:[%s1684_s9 + $0x68] sm:$0xff]  ;;  %v252_v7 = vld [vmem:[%s1684_s9 + $0x70] sm:$0x3] }
  0x22   : > { %v314_v8 = vrot.slane %v1696_v6, 1  ;;  %v316_v9 = vrot.slane %v252_v7, 1  ;;  %v1701_v10 = vld [vmem:[%s1684_s9 + $0x60] sm:$0xff]  ;;  %v355_v14 = vrot.slane %v1696_v6, 2  ;;  %v334_v15 = vrot.slane %v1691_v2, 2  ;;  %v1737_v26 = vld [vmem:[%s1684_s9 + $0x78] sm:$0xff] }
  0x23   : > { %v297_v11 = vsel %vm292_vm0, %v294_v3, %v296_v4  ;;  %v295_v12 = vsel %vm292_vm0, %v293_v5, %v294_v3  ;;  %v313_v13 = vrot.slane %v1701_v10, 1  ;;  %v354_v18 = vrot.slane %v1701_v10, 2  ;;  %v1740_v27 = vld [vmem:[%s1684_s9 + $0x18] sm:$0xff]  ;;  %v1743_v28 = vld [vmem:[%s1684_s9 + $0x80] sm:$0xff]  ;;  %v255_v36 = vld [vmem:[%s1684_s9 + $0x88] sm:$0x3] }
  0x24   : > { %402 = vrot.lane.b32.xlu1 %v297_v11, %s1578_s10  ;;  %400 = vrot.lane.b32.xlu0 %v295_v12, %s1578_s10  ;;  %v1711_v16 = vsel %vm292_vm0, %v314_v8, %v316_v9  ;;  %v335_v19 = vrot.slane %v1687_v0, 2  ;;  %v357_v22 = vrot.slane %v252_v7, 2  ;;  %v337_v23 = vrot.slane %v240_v1, 2  ;;  %v1746_v29 = vld [vmem:[%s1684_s9 + $0x20] sm:$0xff]  ;;  %v243_v37 = vld [vmem:[%s1684_s9 + $0x28] sm:$0x3] }
  0x25   : > { %v1714_v17 = vsel %vm292_vm0, %v313_v13, %v314_v8  ;;  %v1723_v20 = vsel %vm333_vm1, %v354_v18, %v355_v14  ;;  %v318_v30 = vrot.slane %v1737_v26, 1  ;;  %v319_v31 = vrot.slane %v1743_v28, 1  ;;  %v1804_v52 = vld [vmem:[%s1684_s9 + $0x90] sm:$0xff]  ;;  %v1817_v54 = vld [vmem:[%s1684_s9 + $0x98] sm:$0xff]  ;;  %v258_v3 = vld [vmem:[%s1684_s9 + $0xa0] sm:$0x3] }
  0x26   : > { %v336_v21 = vsel %vm333_vm1, %v334_v15, %v335_v19  ;;  %v1730_v24 = vsel %vm333_vm1, %v355_v14, %v357_v22  ;;  %v338_v25 = vsel %vm333_vm1, %v335_v19, %v337_v23  ;;  %v298_v32 = vrot.slane %v1740_v27, 1  ;;  %v1807_v53 = vld [vmem:[%s1684_s9 + $0x30] sm:$0xff]  ;;  %v1820_v55 = vld [vmem:[%s1684_s9 + $0x38] sm:$0xff]  ;;  %v246_v4 = vld [vmem:[%s1684_s9 + $0x40] sm:$0x3] }
  0x27   : > { %v299_v33 = vrot.slane %v1746_v29, 1  ;;  %v1761_v34 = vsel %vm292_vm0, %v318_v30, %v319_v31  ;;  %v321_v38 = vrot.slane %v255_v36, 1  ;;  %v301_v39 = vrot.slane %v243_v37, 1  ;;  %2447 = vst [vmem:[#allocation9_spill] sm:$0xff] %v1820_v55  ;;  %v922_v5 = vld [vmem:[%s2429_s1 + $0x10] sm:$0xff]  ;;  %v923_v7 = vld [vmem:[%s2429_s1 + $0x18] sm:$0xff] }
  0x28   : > { %418 = vrot.lane.b32.xlu1 %v1711_v16, %s1578_s10  ;;  %416 = vrot.lane.b32.xlu0 %v1714_v17, %s1578_s10  ;;  %2443 = vst [vmem:[#allocation5_spill] sm:$0xff] %v1761_v34  ;;  %v359_v40 = vrot.slane %v1737_v26, 2  ;;  %v360_v41 = vrot.slane %v1743_v28, 2  ;;  %v339_v44 = vrot.slane %v1740_v27, 2  ;;  %v340_v45 = vrot.slane %v1746_v29, 2  ;;  %v924_v15 = vld [vmem:[%s2429_s1 + $0x20] sm:$0xff] }
  0x29   : > { %v300_v35 = vsel %vm292_vm0, %v298_v32, %v299_v33  ;;  %v1775_v42 = vsel %vm292_vm0, %v319_v31, %v321_v38  ;;  %v302_v43 = vsel %vm292_vm0, %v299_v33, %v301_v39  ;;  %v362_v48 = vrot.slane %v255_v36, 2  ;;  %v925_v18 = vld [vmem:[%s2429_s1 + $0x28] sm:$0xff]  ;;  %v927_v30 = vld [vmem:[%s2429_s1 + $0x38] sm:$0xff] }
  0x2a   : > { %2444 = vst [vmem:[#allocation6_spill] sm:$0xff] %v1775_v42  ;;  %v1784_v46 = vsel %vm333_vm1, %v359_v40, %v360_v41  ;;  %v341_v47 = vsel %vm333_vm1, %v339_v44, %v340_v45  ;;  %v342_v49 = vrot.slane %v243_v37, 2  ;;  %v323_v56 = vrot.slane %v1804_v52, 1  ;;  %v1902_v40 = vld [vmem:[%s1684_s9 + $0xa8] sm:$0xff] }
  0x2b   : > { %2445 = vst [vmem:[#allocation7_spill] sm:$0xff] %v1784_v46  ;;  %v1797_v50 = vsel %vm333_vm1, %v360_v41, %v362_v48  ;;  %v324_v57 = vrot.slane %v1817_v54, 1  ;;  %v303_v58 = vrot.slane %v1807_v53, 1  ;;  %v304_v59 = vrot.slane %v1820_v55, 1  ;;  %2448 = vst [vmem:[#allocation10_spill] sm:$0xff] %v1902_v40  ;;  %v1905_v41 = vld [vmem:[%s1684_s9 + $0x48] sm:$0xff] }
  0x2c   : > { %464 = vrot.lane.b32.xlu1 %v1723_v20, %s1579_s11  ;;  %448 = vrot.lane.b32.xlu0 %v336_v21, %s1579_s11  ;;  %2446 = vst [vmem:[#allocation8_spill] sm:$0xff] %v1797_v50  ;;  %v343_v51 = vsel %vm333_vm1, %v340_v45, %v342_v49  ;;  %v1375_v1 = vpack.c.bf16 %v921_v63, %v920_v62  ;;  %v326_v8 = vrot.slane %v258_v3, 1  ;;  %v306_v9 = vrot.slane %v246_v4, 1 }
  0x2d   : > { %v325_v60 = vsel %vm292_vm0, %v323_v56, %v324_v57  ;;  %v305_v61 = vsel %vm292_vm0, %v303_v58, %v304_v59  ;;  %v1379_v11 = vpack.c.bf16 %v923_v7, %v922_v5  ;;  %v364_v12 = vrot.slane %v1804_v52, 2  ;;  %2449 = vst [vmem:[#allocation11_spill] sm:$0xff] %v1905_v41  ;;  %v1929_v56 = vld [vmem:[%s1684_s9 + $0x50] sm:$0xff]  ;;  %v261_v5 = vld [vmem:[%s1684_s9 + $0xb8] sm:$0x3] }
  0x2e   : > { %1376 = vmatprep.subr.bf16.mxu0 %v1375_v1  ;;  %1391 = vmatprep.subr.bf16.mxu1 %v1375_v1  ;;  %v365_v13 = vrot.slane %v1817_v54, 2  ;;  %v344_v14 = vrot.slane %v1807_v53, 2  ;;  %v327_v19 = vsel %vm292_vm0, %v324_v57, %v326_v8  ;;  %v307_v21 = vsel %vm292_vm0, %v304_v59, %v306_v9  ;;  %2451 = vst [vmem:[#allocation13_spill] sm:$0xff] %v1929_v56  ;;  %v249_v7 = vld [vmem:[%s1684_s9 + $0x58] sm:$0x3] }
  0x2f   : > { %1378 = vmatpush3.bf16.msra.mxu0 %v1375_v1  ;;  %1396 = vmatpush3.bf16.msra.mxu1 %v1375_v1  ;;  %v345_v22 = vrot.slane %v1820_v55, 2  ;;  %v1383_v23 = vpack.c.bf16 %v925_v18, %v924_v15  ;;  %v367_v36 = vrot.slane %v258_v3, 2  ;;  %v347_v37 = vrot.slane %v246_v4, 2 }
  0x30   : > { %466 = vrot.lane.b32.xlu1 %v1730_v24, %s1579_s11  ;;  %450 = vrot.lane.b32.xlu0 %v338_v25, %s1579_s11  ;;  %v926_v25 = vld [vmem:[%s2429_s1 + $0x30] sm:$0xff]  ;;  %v366_v31 = vsel %vm333_vm1, %v364_v12, %v365_v13  ;;  %v328_v57 = vrot.slane %v1902_v40, 1  ;;  %v308_v59 = vrot.slane %v1905_v41, 1  ;;  %v311_v12 = vrot.slane %v249_v7, 1 }
  0x31   : > { %1380 = vmatprep.subr.bf16.mxu0 %v1379_v11  ;;  %1392 = vmatprep.subr.bf16.mxu1 %v1379_v11  ;;  %v346_v32 = vsel %vm333_vm1, %v344_v14, %v345_v22  ;;  %v1387_v33 = vpack.c.bf16 %v927_v30, %v926_v25  ;;  %v368_v38 = vsel %vm333_vm1, %v365_v13, %v367_v36 }
  0x32   : > { %v348_v39 = vsel %vm333_vm1, %v345_v22, %v347_v37  ;;  %v349_v22 = vrot.slane %v1905_v41, 2 }
  0x33   : > { %1382 = vmatpush3.bf16.msra.mxu0 %v1379_v11  ;;  %1397 = vmatpush3.bf16.msra.mxu1 %v1379_v11  ;;  %v331_v11 = vrot.slane %v261_v5, 1 }
  0x34   : > { %512 = vrot.lane.b32.xlu1 %v1737_v26, %s1580_s20  ;;  %496 = vrot.lane.b32.xlu0 %v1740_v27, %s1580_s20 }
  0x35   : > { %1384 = vmatprep.subr.bf16.mxu0 %v1383_v23  ;;  %1393 = vmatprep.subr.bf16.mxu1 %v1383_v23 }
  0x37   : > { %1386 = vmatpush3.bf16.msra.mxu0 %v1383_v23  ;;  %1398 = vmatpush3.bf16.msra.mxu1 %v1383_v23  ;;  %v350_v23 = vrot.slane %v1929_v56, 2 }
  0x38   : > { %514 = vrot.lane.b32.xlu1 %v1743_v28, %s1580_s20  ;;  %498 = vrot.lane.b32.xlu0 %v1746_v29, %s1580_s20 }
  0x39   : > { %1388 = vmatprep.subr.bf16.mxu0 %v1387_v33  ;;  %1394 = vmatprep.subr.bf16.mxu1 %v1387_v33 }
  0x3b   : > { %1390 = vmatpush3.bf16.msra.mxu0 %v1387_v33  ;;  %1399 = vmatpush3.bf16.msra.mxu1 %v1387_v33 }
  0x3c   : > { %560 = vrot.lane.b32.xlu1 %v1761_v34, %s1581_s21  ;;  %544 = vrot.lane.b32.xlu0 %v300_v35, %s1581_s21 }
  0x40   : > { %420 = vrot.lane.b32.xlu1 %v1761_v34, %s1578_s10  ;;  %404 = vrot.lane.b32.xlu0 %v300_v35, %s1578_s10  ;;  %v928_v35 = vld [vmem:[%s2429_s1 + $0x40] sm:$0xff] }
  0x41   : > { %1349 = vmatprep.subr.mxu0 %v928_v35  ;;  %1395 = vmatprep.subr.mxu1 %v928_v35 }
  0x42   : > { %1350 = vmatpush3.msra.mxu0 %v928_v35  ;;  %1400 = vmatpush3.msra.mxu1 %v928_v35 }
  0x44   : > { %562 = vrot.lane.b32.xlu1 %v1775_v42, %s1581_s21  ;;  %546 = vrot.lane.b32.xlu0 %v302_v43, %s1581_s21 }
  0x48   : > { %608 = vrot.lane.b32.xlu1 %v1784_v46, %s1582_s24  ;;  %592 = vrot.lane.b32.xlu0 %v341_v47, %s1582_s24 }
  0x4c   : > { %422 = vrot.lane.b32.xlu1 %v1775_v42, %s1578_s10  ;;  %406 = vrot.lane.b32.xlu0 %v302_v43, %s1578_s10 }
  0x50   : > { %468 = vrot.lane.b32.xlu1 %v1784_v46, %s1579_s11  ;;  %452 = vrot.lane.b32.xlu0 %v341_v47, %s1579_s11 }
  0x54   : > { %610 = vrot.lane.b32.xlu1 %v1797_v50, %s1582_s24  ;;  %594 = vrot.lane.b32.xlu0 %v343_v51, %s1582_s24 }
  0x58   : > { %656 = vrot.lane.b32.xlu1 %v1804_v52, %s1583_s27  ;;  %640 = vrot.lane.b32.xlu0 %v1807_v53, %s1583_s27 }
  0x5c   : > { %470 = vrot.lane.b32.xlu1 %v1797_v50, %s1579_s11  ;;  %454 = vrot.lane.b32.xlu0 %v343_v51, %s1579_s11  ;;  %v1926_v51 = vld [vmem:[%s1684_s9 + $0xb0] sm:$0xff] }
  0x5d   : > { %2450 = vst [vmem:[#allocation12_spill] sm:$0xff] %v1926_v51  ;;  %v329_v58 = vrot.slane %v1926_v51, 1 }
  0x5f   : > { %v330_v63 = vsel %vm292_vm0, %v328_v57, %v329_v58  ;;  %v332_v15 = vsel %vm292_vm0, %v329_v58, %v331_v11  ;;  %v372_v57 = vrot.slane %v261_v5, 2  ;;  %v352_v58 = vrot.slane %v249_v7, 2 }
  0x60   : > { %516 = vrot.lane.b32.xlu1 %v1804_v52, %s1580_s20  ;;  %500 = vrot.lane.b32.xlu0 %v1807_v53, %s1580_s20 }
  0x64   : > { %658 = vrot.lane.b32.xlu1 %v1817_v54, %s1583_s27  ;;  %642 = vrot.lane.b32.xlu0 %v1820_v55, %s1583_s27 }
  0x68   : > { %704 = vrot.lane.b32.xlu1 %v325_v60, %s1584_s6  ;;  %688 = vrot.lane.b32.xlu0 %v305_v61, %s1584_s6 }
  0x6c   : > { %518 = vrot.lane.b32.xlu1 %v1817_v54, %s1580_s20  ;;  %502 = vrot.lane.b32.xlu0 %v1820_v55, %s1580_s20 }
  0x70   : > { %564 = vrot.lane.b32.xlu1 %v325_v60, %s1581_s21  ;;  %548 = vrot.lane.b32.xlu0 %v305_v61, %s1581_s21 }
  0x74   : > { %706 = vrot.lane.b32.xlu1 %v327_v19, %s1584_s6  ;;  %690 = vrot.lane.b32.xlu0 %v307_v21, %s1584_s6 }
  0x78   : > { %752 = vrot.lane.b32.xlu1 %v366_v31, %s1585_s7  ;;  %736 = vrot.lane.b32.xlu0 %v346_v32, %s1585_s7 }
  0x7c   : > { %424 = vrot.lane.b32.xlu1 %v325_v60, %s1578_s10  ;;  %408 = vrot.lane.b32.xlu0 %v305_v61, %s1578_s10  ;;  %v309_v60 = vrot.slane %v1929_v56, 1 }
  0x7e   : > { %v310_v1 = vsel %vm292_vm0, %v308_v59, %v309_v60  ;;  %v312_v18 = vsel %vm292_vm0, %v309_v60, %v311_v12 }
  0x80   : > { %566 = vrot.lane.b32.xlu1 %v327_v19, %s1581_s21  ;;  %550 = vrot.lane.b32.xlu0 %v307_v21, %s1581_s21 }
  0x84   : > { %612 = vrot.lane.b32.xlu1 %v366_v31, %s1582_s24  ;;  %596 = vrot.lane.b32.xlu0 %v346_v32, %s1582_s24 }
  0x88   : > { %754 = vrot.lane.b32.xlu1 %v368_v38, %s1585_s7  ;;  %738 = vrot.lane.b32.xlu0 %v348_v39, %s1585_s7 }
  0x8c   : > { %426 = vrot.lane.b32.xlu1 %v327_v19, %s1578_s10  ;;  %410 = vrot.lane.b32.xlu0 %v307_v21, %s1578_s10  ;;  %v369_v19 = vrot.slane %v1902_v40, 2  ;;  %v370_v21 = vrot.slane %v1926_v51, 2 }
  0x90   : > { %472 = vrot.lane.b32.xlu1 %v366_v31, %s1579_s11  ;;  %456 = vrot.lane.b32.xlu0 %v346_v32, %s1579_s11  ;;  %v371_v31 = vsel %vm333_vm1, %v369_v19, %v370_v21  ;;  %v351_v32 = vsel %vm333_vm1, %v349_v22, %v350_v23 }
  0x94   : > { %614 = vrot.lane.b32.xlu1 %v368_v38, %s1582_s24  ;;  %598 = vrot.lane.b32.xlu0 %v348_v39, %s1582_s24 }
  0x96   : > { %v1907_v43 = vpop.permute.xlu1 %402  ;;  %v1909_v44 = vpop.permute.xlu0 %400 }
  0x98   : > { %660 = vrot.lane.b32.xlu1 %v1902_v40, %s1583_s27  ;;  %644 = vrot.lane.b32.xlu0 %v1905_v41, %s1583_s27 }
  0x9a   : > { %v1915_v45 = vpop.permute.xlu1 %418  ;;  %v1917_v47 = vpop.permute.xlu0 %416 }
  0x9c   : > { %474 = vrot.lane.b32.xlu1 %v368_v38, %s1579_s11  ;;  %458 = vrot.lane.b32.xlu0 %v348_v39, %s1579_s11 }
  0x9e   : > { %v1921_v48 = vpop.permute.xlu1 %464  ;;  %v1923_v49 = vpop.permute.xlu0 %448 }
  0xa0   : > { %520 = vrot.lane.b32.xlu1 %v1902_v40, %s1580_s20  ;;  %504 = vrot.lane.b32.xlu0 %v1905_v41, %s1580_s20 }
  0xa2   : > { %v1939_v61 = vpop.permute.xlu1 %466  ;;  %v1941_v62 = vpop.permute.xlu0 %450 }
  0xa4   : > { %662 = vrot.lane.b32.xlu1 %v1926_v51, %s1583_s27  ;;  %646 = vrot.lane.b32.xlu0 %v1929_v56, %s1583_s27 }
  0xa6   : > { %v1949_v3 = vpop.permute.xlu1 %512  ;;  %v1951_v4 = vpop.permute.xlu0 %496 }
  0xa8   : > { %708 = vrot.lane.b32.xlu1 %v330_v63, %s1584_s6  ;;  %692 = vrot.lane.b32.xlu0 %v310_v1, %s1584_s6 }
  0xaa   : > { %v1957_v8 = vpop.permute.xlu1 %514  ;;  %v1959_v9 = vpop.permute.xlu0 %498 }
  0xac   : > { %522 = vrot.lane.b32.xlu1 %v1926_v51, %s1580_s20  ;;  %506 = vrot.lane.b32.xlu0 %v1929_v56, %s1580_s20  ;;  %v2041_v51 = vld [vmem:[%s1684_s9 + $0xc8] sm:$0xff] }
  0xad   : > { %v378_v46 = vrot.slane %v2041_v51, 1 }
  0xae   : > { %v1965_v13 = vpop.permute.xlu1 %560  ;;  %v1967_v14 = vpop.permute.xlu0 %544 }
  0xb0   : > { %568 = vrot.lane.b32.xlu1 %v330_v63, %s1581_s21  ;;  %552 = vrot.lane.b32.xlu0 %v310_v1, %s1581_s21 }
  0xb2   : > { %v421_v25 = vpop.permute.xlu1 %420  ;;  %v405_v30 = vpop.permute.xlu0 %404 }
  0xb3   : > { %v795_v41 = vsel %vm784_vm2, %v1737_v26, %v421_v25  ;;  %v787_v40 = vsel %vm784_vm2, %v1740_v27, %v405_v30 }
  0xb4   : > { %710 = vrot.lane.b32.xlu1 %v332_v15, %s1584_s6  ;;  %694 = vrot.lane.b32.xlu0 %v312_v18, %s1584_s6 }
  0xb6   : > { %v1981_v33 = vpop.permute.xlu1 %562  ;;  %v1983_v35 = vpop.permute.xlu0 %546 }
  0xb8   : > { %756 = vrot.lane.b32.xlu1 %v371_v31, %s1585_s7  ;;  %740 = vrot.lane.b32.xlu0 %v351_v32, %s1585_s7 }
  0xba   : > { %v1987_v36 = vpop.permute.xlu1 %608  ;;  %v1989_v37 = vpop.permute.xlu0 %592 }
  0xbc   : > { %428 = vrot.lane.b32.xlu1 %v330_v63, %s1578_s10  ;;  %412 = vrot.lane.b32.xlu0 %v310_v1, %s1578_s10  ;;  %v373_v63 = vsel %vm333_vm1, %v370_v21, %v372_v57  ;;  %v353_v1 = vsel %vm333_vm1, %v350_v23, %v352_v58  ;;  %v2024_v57 = vld [vmem:[%s1684_s9 + $0xc0] sm:$0xff] }
  0xbd   : > { %v377_v50 = vrot.slane %v2024_v57, 1 }
  0xbe   : > { %v1993_v38 = vpop.permute.xlu1 %422  ;;  %v1995_v39 = vpop.permute.xlu0 %406 }
  0xc0   : > { %570 = vrot.lane.b32.xlu1 %v332_v15, %s1581_s21  ;;  %554 = vrot.lane.b32.xlu0 %v312_v18, %s1581_s21 }
  0xc2   : > { %v469_v59 = vpop.permute.xlu1 %468  ;;  %v453_v60 = vpop.permute.xlu0 %452 }
  0xc4   : > { %616 = vrot.lane.b32.xlu1 %v371_v31, %s1582_s24  ;;  %600 = vrot.lane.b32.xlu0 %v351_v32, %s1582_s24 }
  0xc6   : > { %v2003_v11 = vpop.permute.xlu1 %610  ;;  %v2005_v12 = vpop.permute.xlu0 %594 }
  0xc8   : > { %758 = vrot.lane.b32.xlu1 %v373_v63, %s1585_s7  ;;  %742 = vrot.lane.b32.xlu0 %v353_v1, %s1585_s7 }
  0xca   : > { %v2009_v5 = vpop.permute.xlu1 %656  ;;  %v2011_v7 = vpop.permute.xlu0 %640 }
  0xcc   : > { %430 = vrot.lane.b32.xlu1 %v332_v15, %s1578_s10  ;;  %414 = vrot.lane.b32.xlu0 %v312_v18, %s1578_s10 }
  0xce   : > { %v2015_v19 = vpop.permute.xlu1 %470  ;;  %v2017_v21 = vpop.permute.xlu0 %454 }
  0xd0   : > { %476 = vrot.lane.b32.xlu1 %v371_v31, %s1579_s11  ;;  %460 = vrot.lane.b32.xlu0 %v351_v32, %s1579_s11 }
  0xd2   : > { %v517_v22 = vpop.permute.xlu1 %516  ;;  %v501_v23 = vpop.permute.xlu0 %500 }
  0xd4   : > { %618 = vrot.lane.b32.xlu1 %v373_v63, %s1582_s24  ;;  %602 = vrot.lane.b32.xlu0 %v353_v1, %s1582_s24 }
  0xd6   : > { %v2026_v15 = vpop.permute.xlu1 %658  ;;  %v2028_v18 = vpop.permute.xlu0 %642 }
  0xd8   : > { %664 = vrot.lane.b32.xlu1 %v2024_v57, %s1583_s27  ;;  %648 = vrot.lane.b32.xlu0 %v1701_v10, %s1583_s27 }
  0xda   : > { %v705_v31 = vpop.permute.xlu1 %704  ;;  %v689_v32 = vpop.permute.xlu0 %688 }
  0xdc   : > { %478 = vrot.lane.b32.xlu1 %v373_v63, %s1579_s11  ;;  %462 = vrot.lane.b32.xlu0 %v353_v1, %s1579_s11  ;;  %v812_v63 = vsel %vm801_vm3, %v795_v41, %v469_v59  ;;  %v804_v1 = vsel %vm801_vm3, %v787_v40, %v453_v60  ;;  %v785_v40 = vsel %vm784_vm2, %v1691_v2, %v1909_v44 }
  0xdd   : > { %v829_v25 = vsel %vm818_vm4, %v812_v63, %v517_v22  ;;  %v821_v42 = vsel %vm818_vm4, %v804_v1, %v501_v23  ;;  %v793_v41 = vsel %vm784_vm2, %v1701_v10, %v1917_v47  ;;  %v379_v60 = vsel %vm292_vm0, %v377_v50, %v378_v46 }
  0xde   : > { %v2036_v58 = vpop.permute.xlu1 %518  ;;  %v2038_v56 = vpop.permute.xlu0 %502  ;;  %v810_v59 = vsel %vm801_vm3, %v793_v41, %v1921_v48  ;;  %v383_v41 = vrot.slane %v2041_v51, 2 }
  0xdf   : > { %v827_v2 = vsel %vm818_vm4, %v810_v59, %v1949_v3 }
  0xe0   : > { %524 = vrot.lane.b32.xlu1 %v2024_v57, %s1580_s20  ;;  %508 = vrot.lane.b32.xlu0 %v1701_v10, %s1580_s20  ;;  %v844_v22 = vsel %vm835_vm5, %v827_v2, %v1965_v13 }
  0xe1   : > { %v861_v50 = vsel %vm852_vm6, %v844_v22, %v1987_v36 }
  0xe2   : > { %v565_v27 = vpop.permute.xlu1 %564  ;;  %v549_v30 = vpop.permute.xlu0 %548  ;;  %v878_v3 = vsel %vm869_vm7, %v861_v50, %v2009_v5 }
  0xe3   : > { %v2058_v34 = vsel %vm835_vm5, %v829_v25, %v565_v27  ;;  %v2061_v55 = vsel %vm835_vm5, %v821_v42, %v549_v30  ;;  %v802_v42 = vsel %vm801_vm3, %v785_v40, %v1923_v49  ;;  %v895_v13 = vsel %vm886_vm8, %v878_v3, %v705_v31 }
  0xe4   : > { %666 = vrot.lane.b32.xlu1 %v2041_v51, %s1583_s27  ;;  %650 = vrot.lane.b32.xlu0 %v1696_v6, %s1583_s27  ;;  %v819_v10 = vsel %vm818_vm4, %v802_v42, %v1951_v4  ;;  %v788_v25 = vsel %vm784_vm2, %v1746_v29, %v1995_v39  ;;  %v382_v27 = vrot.slane %v2024_v57, 2 }
  0xe5   : > { %v836_v48 = vsel %vm835_vm5, %v819_v10, %v1967_v14  ;;  %v805_v40 = vsel %vm801_vm3, %v788_v25, %v2017_v21 }
  0xe6   : > { %v707_v44 = vpop.permute.xlu1 %706  ;;  %v691_v47 = vpop.permute.xlu0 %690  ;;  %v853_v49 = vsel %vm852_vm6, %v836_v48, %v1989_v37  ;;  %v264_v37 = vld [vmem:[%s1684_s9 + $0xd0] sm:$0x3]  ;;  %v822_v39 = vsel %vm818_vm4, %v805_v40, %v2038_v56 }
  0xe7   : > { %v870_v4 = vsel %vm869_vm7, %v853_v49, %v2011_v7  ;;  %v380_v5 = vrot.slane %v264_v37, 1 }
  0xe8   : > { %712 = vrot.lane.b32.xlu1 %v379_v60, %s1584_s6  ;;  %696 = vrot.lane.b32.xlu0 %v1714_v17, %s1584_s6  ;;  %v887_v14 = vsel %vm886_vm8, %v870_v4, %v689_v32  ;;  %v796_v32 = vsel %vm784_vm2, %v1743_v28, %v1993_v38 }
  0xe9   : > { %v813_v30 = vsel %vm801_vm3, %v796_v32, %v2015_v19  ;;  %v381_v38 = vsel %vm292_vm0, %v378_v46, %v380_v5  ;;  %v794_v46 = vsel %vm784_vm2, %v1696_v6, %v1915_v45 }
  0xea   : > { %v753_v36 = vpop.permute.xlu1 %752  ;;  %v737_v23 = vpop.permute.xlu0 %736  ;;  %v830_v29 = vsel %vm818_vm4, %v813_v30, %v2036_v58  ;;  %v384_v58 = vsel %vm333_vm1, %v382_v27, %v383_v41 }
  0xeb   : > { %v912_v63 = vsel %vm903_vm9, %v895_v13, %v753_v36  ;;  %v904_v1 = vsel %vm903_vm9, %v887_v14, %v737_v23  ;;  %v266_v14 = vld [vmem:[%s1684_s9 + $0xe0] sm:$0xff] }
  0xec   : > { %526 = vrot.lane.b32.xlu1 %v2041_v51, %s1580_s20  ;;  %1363 = vmatprep.mubr.msk.f32.mxu1 %vm936_vm10, %v912_v63  ;;  %v811_v51 = vsel %vm801_vm3, %v794_v46, %v1939_v61  ;;  %v391_v23 = vrot.slane %v266_v14, 1  ;;  %v2452_v63 = vld [vmem:[#allocation9_spill] sm:$0xff] }
  0xed   : > { %510 = vrot.lane.b32.xlu0 %v1696_v6, %s1580_s20  ;;  %1351 = vmatprep.mubr.msk.f32.mxu0 %vm936_vm10, %v904_v1 }
  0xee   : > { %v425_v7 = vpop.permute.xlu1 %424  ;;  %v409_v31 = vpop.permute.xlu0 %408 }
  0xef   : > { %v797_v22 = vsel %vm784_vm2, %v1804_v52, %v425_v7  ;;  %v265_v52 = vld [vmem:[%s1684_s9 + $0xd8] sm:$0xff] }
  0xf0   : > { %572 = vrot.lane.b32.xlu1 %v379_v60, %s1581_s21  ;;  %v390_v36 = vrot.slane %v265_v52, 1 }
  0xf1   : > { %556 = vrot.lane.b32.xlu0 %v1714_v17, %s1581_s21  ;;  %v786_v17 = vsel %vm784_vm2, %v1687_v0, %v1907_v43  ;;  %v828_v0 = vsel %vm818_vm4, %v811_v51, %v1957_v8 }
  0xf2   : > { %v567_v57 = vpop.permute.xlu1 %566  ;;  %v551_v59 = vpop.permute.xlu0 %550  ;;  %v803_v56 = vsel %vm801_vm3, %v786_v17, %v1941_v62  ;;  %v845_v61 = vsel %vm835_vm5, %v828_v0, %v1981_v33 }
  0xf3   : > { %v2129_v19 = vsel %vm835_vm5, %v830_v29, %v567_v57  ;;  %v2132_v21 = vsel %vm835_vm5, %v822_v39, %v551_v59  ;;  %v820_v43 = vsel %vm818_vm4, %v803_v56, %v1959_v9  ;;  %v862_v42 = vsel %vm852_vm6, %v845_v61, %v2003_v11  ;;  %v2453_v29 = vld [vmem:[#allocation5_spill] sm:$0xff]  ;;  %v2454_v59 = vld [vmem:[#allocation6_spill] sm:$0xff] }
  0xf4   : > { %714 = vrot.lane.b32.xlu1 %v381_v38, %s1584_s6  ;;  %v837_v62 = vsel %vm835_vm5, %v820_v43, %v1983_v35  ;;  %v879_v8 = vsel %vm869_vm7, %v862_v42, %v2026_v15  ;;  %v385_v15 = vrot.slane %v264_v37, 2 }
  0xf5   : > { %698 = vrot.lane.b32.xlu0 %v1711_v16, %s1584_s6  ;;  %v854_v60 = vsel %vm852_vm6, %v837_v62, %v2005_v12  ;;  %v896_v33 = vsel %vm886_vm8, %v879_v8, %v707_v44 }
  0xf6   : > { %v2152_v6 = vpop.permute.xlu1 %612  ;;  %v2154_v45 = vpop.permute.xlu0 %596  ;;  %v871_v9 = vsel %vm869_vm7, %v854_v60, %v2028_v18  ;;  %v2456_v60 = vld [vmem:[#allocation8_spill] sm:$0xff] }
  0xf7   : > { %v888_v35 = vsel %vm886_vm8, %v871_v9, %v691_v47  ;;  %v386_v47 = vsel %vm333_vm1, %v383_v41, %v385_v15  ;;  %v395_v41 = vrot.slane %v265_v52, 2 }
  0xf8   : > { %760 = vrot.lane.b32.xlu1 %v384_v58, %s1585_s7 }
  0xf9   : > { %744 = vrot.lane.b32.xlu0 %v1723_v20, %s1585_s7 }
  0xfa   : > { %v755_v2 = vpop.permute.xlu1 %754  ;;  %v739_v11 = vpop.permute.xlu0 %738 }
  0xfb   : > { %v913_v10 = vsel %vm903_vm9, %v896_v33, %v755_v2  ;;  %v905_v12 = vsel %vm903_vm9, %v888_v35, %v739_v11 }
  0xfc   : > { %574 = vrot.lane.b32.xlu1 %v381_v38, %s1581_s21  ;;  %1364 = vmatmul.mubr.msk.f32.vlgmr.msra.gmra.mrb[0].mxu1 %vm936_vm10, %v913_v10  ;;  %v396_v38 = vrot.slane %v266_v14, 2  ;;  %v863_v10 = vsel %vm852_vm6, %v2058_v34, %v2152_v6 }
  0xfd   : > { %558 = vrot.lane.b32.xlu0 %v1711_v16, %s1581_s21  ;;  %1352 = vmatmul.mubr.msk.f32.vlgmr.msra.gmra.mrb[0].mxu0 %vm936_vm10, %v905_v12  ;;  %v789_v16 = vsel %vm784_vm2, %v1807_v53, %v409_v31  ;;  %v855_v12 = vsel %vm852_vm6, %v2061_v55, %v2154_v45 }
  0xfe   : > { %v427_v18 = vpop.permute.xlu1 %426  ;;  %v411_v44 = vpop.permute.xlu0 %410  ;;  %v397_v17 = vsel %vm333_vm1, %v395_v41, %v396_v38 }
  0xff   : > { %v798_v37 = vsel %vm784_vm2, %v1817_v54, %v427_v18  ;;  %v790_v1 = vsel %vm784_vm2, %v2452_v63, %v411_v44 }
 0x100   : > { %620 = vrot.lane.b32.xlu1 %v384_v58, %s1582_s24  ;;  %v2455_v58 = vld [vmem:[#allocation7_spill] sm:$0xff] }
 0x101   : > { %604 = vrot.lane.b32.xlu0 %v1723_v20, %s1582_s24 }
 0x102   : > { %v473_v48 = vpop.permute.xlu1 %472  ;;  %v457_v50 = vpop.permute.xlu0 %456 }
 0x103   : > { %v814_v49 = vsel %vm801_vm3, %v797_v22, %v473_v48  ;;  %v806_v3 = vsel %vm801_vm3, %v789_v16, %v457_v50 }
 0x104   : > { %762 = vrot.lane.b32.xlu1 %v386_v47, %s1585_s7 }
 0x105   : > { %746 = vrot.lane.b32.xlu0 %v1730_v24, %s1585_s7 }
 0x106   : > { %v2193_v20 = vpop.permute.xlu1 %614  ;;  %v2195_v4 = vpop.permute.xlu0 %598 }
 0x108   : > { %622 = vrot.lane.b32.xlu1 %v386_v47, %s1582_s24 }
 0x109   : > { %606 = vrot.lane.b32.xlu0 %v1730_v24, %s1582_s24  ;;  %v267_v24 = vld [vmem:[%s1684_s9 + $0xe8] sm:$0x3]  ;;  %s218_s9 = sand.u32 1, %s1552_s13  }
 0x10a   : > { %v661_v53 = vpop.permute.xlu1 %660  ;;  %v645_v13 = vpop.permute.xlu0 %644  ;;  %v393_v25 = vrot.slane %v267_v24, 1  ;;  %v398_v46 = vrot.slane %v267_v24, 2  ;;  %s1280_s11 = sshll.u32 %s218_s9, 7 }
 0x10b   : > { %v880_v15 = vsel %vm869_vm7, %v863_v10, %v661_v53  ;;  %v872_v18 = vsel %vm869_vm7, %v855_v12, %v645_v13  ;;  %v864_v13 = vsel %vm852_vm6, %v2129_v19, %v2193_v20  ;;  %v2457_v20 = vld [vmem:[#allocation10_spill] sm:$0xff]  ;;  %s2345_s24 = scalar_lea.vmem [#allocation2], %s1280_s11  ;;  %s1586_s11 = smov [#allocation2]  }
 0x10c   : > { %668 = vrot.lane.b32.xlu1 %v265_v52, %s1583_s27  ;;  %v394_v39 = vsel %vm292_vm0, %v391_v23, %v393_v25  ;;  %v399_v0 = vsel %vm333_vm1, %v396_v38, %v398_v46  ;;  %s1164_s5 = sshll.u32 %s2345_s24, 4  ;;  %s1486_s20 = sshll.u32 %s1586_s11, 4  ;;  %s2368_s5 = int_to_ptr.vmem [resolvable:$true] %s1164_s5  ;;  %s1487_s20 = int_to_ptr.vmem [resolvable:$false] %s1486_s20 }
 0x10d   : > { %652 = vrot.lane.b32.xlu0 %v1737_v26, %s1583_s27  ;;  %v392_v26 = vsel %vm292_vm0, %v390_v36, %v391_v23  ;;  %s1482_s28 = scalar_lea.vmem %s2368_s5, 2048  ;;  %s1488_s21 = scalar_lea.vmem %s1487_s20, 4096 }
 0x10e   : > { %v475_v5 = vpop.permute.xlu1 %474  ;;  %v459_v7 = vpop.permute.xlu0 %458  ;;  %p1483_p13 = scmp.ne.s32.totalorder %s2368_s5, %s1482_s28  ;;  %p1489_p2 = scmp.lt.s32.totalorder %s2368_s5, %s1487_s20 }
 0x10f   : > { %v815_v31 = vsel %vm801_vm3, %v798_v37, %v475_v5  ;;  %v807_v32 = vsel %vm801_vm3, %v790_v1, %v459_v7  ;;  %p1490_p4 = scmp.lt.s32.totalorder %s1488_s21, %s1482_s28 }
 0x110   : > { %670 = vrot.lane.b32.xlu1 %v266_v14, %s1583_s27  ;;  %v856_v14 = vsel %vm852_vm6, %v2132_v21, %v2195_v4  ;;  %p1484_p0 = pnand %p1483_p13, %p1659_p3 }
 0x111   : > { %654 = vrot.lane.b32.xlu0 %v1743_v28, %s1583_s27  ;;  %s1307_s27 = sshll.u32 %s1560_s15, 4  ;;  %p1491_p5 = por %p1490_p4, %p1489_p2 }
 0x112   : > { %v521_v27 = vpop.permute.xlu1 %520  ;;  %v505_v54 = vpop.permute.xlu0 %504  ;;  %p1485_p1 = pneg %p1484_p0 }
 0x113   : > { %v831_v30 = vsel %vm818_vm4, %v814_v49, %v521_v27  ;;  %v823_v40 = vsel %vm818_vm4, %v806_v3, %v505_v54 }
 0x114   : > { %716 = vrot.lane.b32.xlu1 %v392_v26, %s1584_s6  ;;  %p1492_p6 = pnand %p1491_p5, %p1485_p1 }
 0x115   : > { %700 = vrot.lane.b32.xlu0 %v2453_v29, %s1584_s6 }
 0x116   : > { %v663_v57 = vpop.permute.xlu1 %662  ;;  %v647_v28 = vpop.permute.xlu0 %646 }
 0x117   : > { %v881_v36 = vsel %vm869_vm7, %v864_v13, %v663_v57  ;;  %v873_v23 = vsel %vm869_vm7, %v856_v14, %v647_v28 }
 0x118   : > { %718 = vrot.lane.b32.xlu1 %v394_v39, %s1584_s6 }
 0x119   : > { %702 = vrot.lane.b32.xlu0 %v2454_v59, %s1584_s6  ;;  %s1303_s6 = sshll.u32 %s1564_s16, 5  ;;  %s2375_s16 = scalar_lea.sflag [#allocation3], %s218_s9 }
 0x11a   : > { %v709_v51 = vpop.permute.xlu1 %708  ;;  %v693_v56 = vpop.permute.xlu0 %692  ;;  %s1161_s29 = sadd.s32 %s1307_s27, %s1303_s6 }
 0x11b   : > { %v897_v44 = vsel %vm886_vm8, %v880_v15, %v709_v51  ;;  %v889_v47 = vsel %vm886_vm8, %v872_v18, %v693_v56  ;;  %s1304_s4 = sshll.u32 %s1161_s29, 7 }
 0x11c   : > { %764 = vrot.lane.b32.xlu1 %v397_v17, %s1585_s7  ;;  %s2365_s15 = scalar_lea.hbm %s2431_s3, %s1304_s4 }
 0x11d   : > { %748 = vrot.lane.b32.xlu0 %v2455_v58, %s1585_s7 }
 0x11e   : > { %v523_v43 = vpop.permute.xlu1 %522  ;;  %v507_v61 = vpop.permute.xlu0 %506 }
 0x11f   : > { %v832_v62 = vsel %vm818_vm4, %v815_v31, %v523_v43  ;;  %v824_v42 = vsel %vm818_vm4, %v807_v32, %v507_v61  ;;  %v2458_v31 = vld [vmem:[#allocation11_spill] sm:$0xff] }
 0x120   : > { %766 = vrot.lane.b32.xlu1 %v399_v0, %s1585_s7 }
 0x121   : > { %750 = vrot.lane.b32.xlu0 %v2456_v60, %s1585_s7 }
 0x122   : > { %v569_v8 = vpop.permute.xlu1 %568  ;;  %v553_v9 = vpop.permute.xlu0 %552 }
 0x123   : > { %v2236_v33 = vsel %vm835_vm5, %v831_v30, %v569_v8  ;;  %v2239_v35 = vsel %vm835_vm5, %v823_v40, %v553_v9 }
 0x126   : > { %v711_v2 = vpop.permute.xlu1 %710  ;;  %v695_v11 = vpop.permute.xlu0 %694 }
 0x127   : > { %v898_v37 = vsel %vm886_vm8, %v881_v36, %v711_v2  ;;  %v890_v63 = vsel %vm886_vm8, %v873_v23, %v695_v11 }
 0x12a   : > { %v757_v22 = vpop.permute.xlu1 %756  ;;  %v741_v16 = vpop.permute.xlu0 %740 }
 0x12b   : > { %v914_v48 = vsel %vm903_vm9, %v897_v44, %v757_v22  ;;  %v906_v50 = vsel %vm903_vm9, %v889_v47, %v741_v16 }
 0x12c   : > { %1354 = vmatprep.mubr.msk.f32.mxu0 %vm936_vm10, %v906_v50  ;;  %1366 = vmatprep.mubr.msk.f32.mxu1 %vm936_vm10, %v914_v48 }
 0x12e   : > { %v429_v34 = vpop.permute.xlu1 %428  ;;  %v413_v55 = vpop.permute.xlu0 %412 }
 0x12f   : > { %v799_v4 = vsel %vm784_vm2, %v2457_v20, %v429_v34  ;;  %v791_v32 = vsel %vm784_vm2, %v2458_v31, %v413_v55 }
 0x132   : > { %v571_v6 = vpop.permute.xlu1 %570  ;;  %v555_v45 = vpop.permute.xlu0 %554 }
 0x133   : > { %v849_v49 = vsel %vm835_vm5, %v832_v62, %v571_v6  ;;  %v841_v3 = vsel %vm835_vm5, %v824_v42, %v555_v45 }
 0x136   : > { %v617_v52 = vpop.permute.xlu1 %616  ;;  %v601_v53 = vpop.permute.xlu0 %600 }
 0x137   : > { %v865_v42 = vsel %vm852_vm6, %v2236_v33, %v617_v52  ;;  %v857_v60 = vsel %vm852_vm6, %v2239_v35, %v601_v53 }
 0x13a   : > { %v759_v1 = vpop.permute.xlu1 %758  ;;  %v743_v5 = vpop.permute.xlu0 %742 }
 0x13b   : > { %v915_v7 = vsel %vm903_vm9, %v898_v37, %v759_v1  ;;  %v907_v24 = vsel %vm903_vm9, %v890_v63, %v743_v5 }
 0x13c   : > { %1355 = vmatmul.mubr.msk.f32.gmra.mrb[2].mxu0 %vm936_vm10, %v907_v24  ;;  %1367 = vmatmul.mubr.msk.f32.gmra.mrb[2].mxu1 %vm936_vm10, %v915_v7 }
 0x13e   : > { %v2271_v19 = vpop.permute.xlu1 %430  ;;  %v2273_v21 = vpop.permute.xlu0 %414 }
 0x142   : > { %v477_v26 = vpop.permute.xlu1 %476  ;;  %v461_v25 = vpop.permute.xlu0 %460 }
 0x143   : > { %v816_v27 = vsel %vm801_vm3, %v799_v4, %v477_v26  ;;  %v808_v54 = vsel %vm801_vm3, %v791_v32, %v461_v25  ;;  %v2459_v4 = vld [vmem:[#allocation12_spill] sm:$0xff]  ;;  %v2460_v25 = vld [vmem:[#allocation13_spill] sm:$0xff] }
 0x144   : > { %v800_v31 = vsel %vm784_vm2, %v2459_v4, %v2271_v19 }
 0x146   : > { %v619_v30 = vpop.permute.xlu1 %618  ;;  %v603_v40 = vpop.permute.xlu0 %602 }
 0x147   : > { %v866_v22 = vsel %vm852_vm6, %v849_v49, %v619_v30  ;;  %v858_v16 = vsel %vm852_vm6, %v841_v3, %v603_v40  ;;  %v792_v30 = vsel %vm784_vm2, %v2460_v25, %v2273_v21 }
 0x14a   : > { %v665_v41 = vpop.permute.xlu1 %664  ;;  %v649_v38 = vpop.permute.xlu0 %648 }
 0x14b   : > { %v882_v8 = vsel %vm869_vm7, %v865_v42, %v665_v41  ;;  %v874_v9 = vsel %vm869_vm7, %v857_v60, %v649_v38 }
 0x14e   : > { %v479_v29 = vpop.permute.xlu1 %478  ;;  %v463_v39 = vpop.permute.xlu0 %462 }
 0x14f   : > { %v809_v41 = vsel %vm801_vm3, %v792_v30, %v463_v39 }
 0x152   : > { %v525_v57 = vpop.permute.xlu1 %524  ;;  %v509_v28 = vpop.permute.xlu0 %508 }
 0x153   : > { %v833_v1 = vsel %vm818_vm4, %v816_v27, %v525_v57  ;;  %v825_v7 = vsel %vm818_vm4, %v808_v54, %v509_v28  ;;  %v817_v27 = vsel %vm801_vm3, %v800_v31, %v479_v29 }
 0x156   : > { %v667_v59 = vpop.permute.xlu1 %666  ;;  %v651_v17 = vpop.permute.xlu0 %650 }
 0x157   : > { %v883_v48 = vsel %vm869_vm7, %v866_v22, %v667_v59  ;;  %v875_v50 = vsel %vm869_vm7, %v858_v16, %v651_v17 }
 0x15a   : > { %v713_v46 = vpop.permute.xlu1 %712  ;;  %v697_v51 = vpop.permute.xlu0 %696 }
 0x15b   : > { %v899_v2 = vsel %vm886_vm8, %v882_v8, %v713_v46  ;;  %v891_v10 = vsel %vm886_vm8, %v874_v9, %v697_v51 }
 0x15e   : > { %v527_v56 = vpop.permute.xlu1 %526 }
 0x15f   : > { %v511_v58 = vpop.permute.xlu0 %510  ;;  %v834_v38 = vsel %vm818_vm4, %v817_v27, %v527_v56 }
 0x160   : > { %v826_v59 = vsel %vm818_vm4, %v809_v41, %v511_v58 }
 0x162   : > { %v573_v0 = vpop.permute.xlu1 %572 }
 0x163   : > { %v557_v43 = vpop.permute.xlu0 %556  ;;  %v850_v24 = vsel %vm835_vm5, %v833_v1, %v573_v0 }
 0x164   : > { %v842_v32 = vsel %vm835_vm5, %v825_v7, %v557_v43 }
 0x166   : > { %v715_v61 = vpop.permute.xlu1 %714 }
 0x167   : > { %v699_v62 = vpop.permute.xlu0 %698  ;;  %v900_v34 = vsel %vm886_vm8, %v883_v48, %v715_v61 }
 0x168   : > { %v892_v6 = vsel %vm886_vm8, %v875_v50, %v699_v62 }
 0x16a   : > { %v761_v11 = vpop.permute.xlu1 %760 }
 0x16b   : > { %v916_v12 = vsel %vm903_vm9, %v899_v2, %v761_v11  ;;  %v745_v15 = vpop.permute.xlu0 %744  ;;  %v1283_v2 = vld [vmem:[%s2430_s2] ss:$0 sm:$0xff] }
 0x16c   : > { %v908_v18 = vsel %vm903_vm9, %v891_v10, %v745_v15  ;;  %1369 = vmatprep.mubr.msk.f32.mxu1 %vm936_vm10, %v916_v12 }
 0x16d   : > { %1357 = vmatprep.mubr.msk.f32.mxu0 %vm936_vm10, %v908_v18 }
 0x16e   : > { %v575_v33 = vpop.permute.xlu1 %574 }
 0x16f   : > { %v559_v35 = vpop.permute.xlu0 %558  ;;  %v851_v17 = vsel %vm835_vm5, %v834_v38, %v575_v33 }
 0x170   : > { %v843_v51 = vsel %vm835_vm5, %v826_v59, %v559_v35 }
 0x172   : > { %v621_v44 = vpop.permute.xlu1 %620 }
 0x173   : > { %v605_v47 = vpop.permute.xlu0 %604  ;;  %v867_v26 = vsel %vm852_vm6, %v850_v24, %v621_v44 }
 0x174   : > { %v859_v40 = vsel %vm852_vm6, %v842_v32, %v605_v47 }
 0x176   : > { %v763_v55 = vpop.permute.xlu1 %762 }
 0x177   : > { %v917_v45 = vsel %vm903_vm9, %v900_v34, %v763_v55  ;;  %v747_v52 = vpop.permute.xlu0 %746 }
 0x178   : > { %v909_v53 = vsel %vm903_vm9, %v892_v6, %v747_v52  ;;  %1370 = vmatmul.mubr.msk.f32.gmra.mrb[4].mxu1 %vm936_vm10, %v917_v45 }
 0x179   : > { %1358 = vmatmul.mubr.msk.f32.gmra.mrb[4].mxu0 %vm936_vm10, %v909_v53 }
 0x17a   : > { %v623_v49 = vpop.permute.xlu1 %622 }
 0x17b   : > { %v607_v3 = vpop.permute.xlu0 %606  ;;  %v868_v39 = vsel %vm852_vm6, %v851_v17, %v623_v49 }
 0x17c   : > { %v860_v0 = vsel %vm852_vm6, %v843_v51, %v607_v3 }
 0x17e   : > { %v669_v13 = vpop.permute.xlu1 %668 }
 0x17f   : > { %v653_v14 = vpop.permute.xlu0 %652  ;;  %v884_v54 = vsel %vm869_vm7, %v867_v26, %v669_v13 }
 0x180   : > { %v876_v19 = vsel %vm869_vm7, %v859_v40, %v653_v14 }
 0x182   : > { %v671_v36 = vpop.permute.xlu1 %670 }
 0x183   : > { %v655_v23 = vpop.permute.xlu0 %654  ;;  %v885_v58 = vsel %vm869_vm7, %v868_v39, %v671_v36 }
 0x184   : > { %v877_v43 = vsel %vm869_vm7, %v860_v0, %v655_v23 }
 0x186   : > { %v717_v37 = vpop.permute.xlu1 %716 }
 0x187   : > { %v701_v63 = vpop.permute.xlu0 %700  ;;  %v901_v57 = vsel %vm886_vm8, %v884_v54, %v717_v37 }
 0x188   : > { %v893_v21 = vsel %vm886_vm8, %v876_v19, %v701_v63 }
 0x18a   : > { %v719_v5 = vpop.permute.xlu1 %718 }
 0x18b   : > { %v703_v20 = vpop.permute.xlu0 %702  ;;  %v902_v61 = vsel %vm886_vm8, %v885_v58, %v719_v5 }
 0x18c   : > { %v894_v42 = vsel %vm886_vm8, %v877_v43, %v703_v20 }
 0x18e   : > { %v765_v28 = vpop.permute.xlu1 %764 }
 0x18f   : > { %v918_v29 = vsel %vm903_vm9, %v901_v57, %v765_v28  ;;  %v749_v46 = vpop.permute.xlu0 %748 }
 0x190   : > { %v910_v56 = vsel %vm903_vm9, %v893_v21, %v749_v46  ;;  %1372 = vmatprep.mubr.msk.f32.mxu1 %vm936_vm10, %v918_v29 }
 0x191   : > { %1360 = vmatprep.mubr.msk.f32.mxu0 %vm936_vm10, %v910_v56 }
 0x192   : > { %v767_v62 = vpop.permute.xlu1 %766 }
 0x193   : > { %v919_v60 = vsel %vm903_vm9, %v902_v61, %v767_v62  ;;  %v751_v8 = vpop.permute.xlu0 %750 }
 0x194   : > { %v911_v9 = vsel %vm903_vm9, %v894_v42, %v751_v8  ;;  %1373 = vmatmul.mubr.msk.f32.gmra.mrb[6].mxu1 %vm936_vm10, %v919_v60 }
 0x195   : > { %1361 = vmatmul.mubr.msk.f32.gmra.mrb[6].mxu0 %vm936_vm10, %v911_v9 }
 0x1cf   : > { %v1365_v11 = vpop.f32.mrb[0].mxu1 }
 0x1d0   : > { %v1353_v10 = vpop.f32.mrb[0].mxu0  ;;  %v1097_v12 = vadd.f32 %v1365_v11, %v1283_v2  ;;  %v1091_v15 = vpop.f32.mrb[1].mxu1 }
 0x1d1   : > { %v1057_v18 = vadd.f32 %v1353_v10, %v1283_v2  ;;  %v1051_v33 = vpop.f32.mrb[1].mxu0  ;;  %v1092_v35 = vadd.f32 %v1283_v2, %v1091_v15 }
 0x1d2   : > { %1139 = vst [vmem:[%s2345_s24 + $0x48] sm:$0xff] %v1097_v12  ;;  %v1052_v44 = vadd.f32 %v1283_v2, %v1051_v33 }
 0x1d3   : > { %1131 = vst [vmem:[%s2345_s24 + $0x8] sm:$0xff] %v1057_v18  ;;  %1138 = vst [vmem:[%s2345_s24 + $0x40] sm:$0xff] %v1092_v35 }
 0x1d4   : > { %1130 = vst [vmem:[%s2345_s24] sm:$0xff] %v1052_v44 }
 0x20f   : > { %v1356_v47 = vpop.f32.mrb[2].mxu0  ;;  %v1368_v22 = vpop.f32.mrb[2].mxu1 }
 0x210   : > { %v1067_v16 = vadd.f32 %v1356_v47, %v1283_v2  ;;  %v1107_v48 = vadd.f32 %v1368_v22, %v1283_v2  ;;  %v1061_v50 = vpop.f32.mrb[3].mxu0  ;;  %v1101_v34 = vpop.f32.mrb[3].mxu1 }
 0x211   : > { %v1062_v55 = vadd.f32 %v1283_v2, %v1061_v50  ;;  %v1102_v6 = vadd.f32 %v1283_v2, %v1101_v34 }
 0x212   : > { %1133 = vst [vmem:[%s2345_s24 + $0x18] sm:$0xff] %v1067_v16  ;;  %1141 = vst [vmem:[%s2345_s24 + $0x58] sm:$0xff] %v1107_v48 }
 0x213   : > { %1132 = vst [vmem:[%s2345_s24 + $0x10] sm:$0xff] %v1062_v55  ;;  %1140 = vst [vmem:[%s2345_s24 + $0x50] sm:$0xff] %v1102_v6 }
 0x24b   : > { %v1371_v45 = vpop.f32.mrb[4].mxu1 }
 0x24c   : > { %v1359_v52 = vpop.f32.mrb[4].mxu0  ;;  %v1117_v53 = vadd.f32 %v1371_v45, %v1283_v2  ;;  %v1111_v49 = vpop.f32.mrb[5].mxu1 }
 0x24d   : > { %v1077_v3 = vadd.f32 %v1359_v52, %v1283_v2  ;;  %v1071_v13 = vpop.f32.mrb[5].mxu0  ;;  %v1112_v14 = vadd.f32 %v1283_v2, %v1111_v49 }
 0x24e   : > { %1143 = vst [vmem:[%s2345_s24 + $0x68] sm:$0xff] %v1117_v53  ;;  %v1072_v36 = vadd.f32 %v1283_v2, %v1071_v13 }
 0x24f   : > { %1135 = vst [vmem:[%s2345_s24 + $0x28] sm:$0xff] %v1077_v3  ;;  %1142 = vst [vmem:[%s2345_s24 + $0x60] sm:$0xff] %v1112_v14 }
 0x250   : > { %1134 = vst [vmem:[%s2345_s24 + $0x20] sm:$0xff] %v1072_v36 }
 0x267   : > { %v1374_v23 = vpop.f32.mrb[6].mxu1 }
 0x268   : > { %v1362_v37 = vpop.f32.mrb[6].mxu0  ;;  %v1127_v63 = vadd.f32 %v1374_v23, %v1283_v2  ;;  %v1121_v1 = vpop.f32.mrb[7].mxu1 }
 0x269   : > { %v1087_v5 = vadd.f32 %v1362_v37, %v1283_v2  ;;  %v1081_v7 = vpop.f32.mrb[7].mxu0  ;;  %v1122_v24 = vadd.f32 %v1283_v2, %v1121_v1 }
 0x26a   : > { %1145 = vst [vmem:[%s2345_s24 + $0x78] sm:$0xff] %v1127_v63  ;;  %v1082_v20 = vadd.f32 %v1283_v2, %v1081_v7 }
 0x26b   : > { %1137 = vst [vmem:[%s2345_s24 + $0x38] sm:$0xff] %v1087_v5  ;;  %1144 = vst [vmem:[%s2345_s24 + $0x70] sm:$0xff] %v1122_v24 }
 0x26c   : > { %1136 = vst [vmem:[%s2345_s24 + $0x30] sm:$0xff] %v1082_v20 }
 0x26d   : > { %1495 = shalt.err (!%p1492_p6)
}
 0x26e   : > { %s1496_s9 = scalar_lea.hbm %s2365_s15, 2048  ;;  %s1500_s6 = scalar_lea.hbm %s2431_s3, 8192 }
 0x26f   : > { %p1497_p7 = scmp.ne.s32.totalorder %s2365_s15, %s1496_s9  ;;  %p1501_p11 = scmp.lt.u32.totalorder %s2365_s15, %s2431_s3 }
 0x270   : > { %p1502_p12 = scmp.lt.u32.totalorder %s1500_s6, %s1496_s9  ;;  %p1504_p0 = scmp.lt.u32.totalorder %s1496_s9, %s2365_s15 }
 0x271   : > { %p1498_p9 = pnand %p1497_p7, %p1659_p3 }
 0x272   : > { %p1503_p13 = por %p1502_p12, %p1501_p11 }
 0x273   : > { %p1499_p10 = pneg %p1498_p9 }
 0x274   : > { %p1505_p1 = por %p1504_p0, %p1503_p13 }
 0x276   : > { %p1506_p2 = pnand %p1505_p1, %p1499_p10 }
 0x278   : > { %1509 = shalt.err (!%p1506_p2)
}
 0x279   : > { %s1587_s7 = smov 128  }
 0x27a   : > { %1402 = dma.vmem_to_hbm [thread:$0]  (%p1659_p3), %s2368_s5, 2048, %s2365_s15, %s2375_s16, %s1587_s7, %s1587_s7, %s1578_s10  }
 0x27b PF: > { %p1408_p4 = scmp.ge.s32.totalorder %s1576_s19, 2  ;;  %s1179_s8 = sand.u32 1, %s1548_s12  }
 0x27c   : > { %s1180_s28 = scalar_lea.sflag [#allocation3], %s1179_s8 }
 0x27d   : > { %p1405_p5 = pnand %p1408_p4, %p1668_p8 }
 0x27f   : > { %1543 = dma.done.wait (!%p1405_p5), %s1180_s28, 2048  }
 0x280   : > { %1545 = vsyncadd (!%p1405_p5), %s1180_s28, 4294965248  ;;  %s16_s19 = sadd.s32 1, %s1576_s19   ;;  %s2461_s12 = smov %s1552_s13 }
 0x281   : > { %p13_p6 = scmp.ge.s32.totalorder %s16_s19, 6   ;;  %s2462_s13 = smov %s1556_s14 }
 0x282   : > { %s2463_s14 = smov %s1677_s30  ;;  %s2464_s15 = smov %s1568_s17 }
 0x283   : > { %s2465_s16 = smov %s1572_s18  ;;  %s2466_s17 = smov %s2469_s22 }
 0x284   : > { %s2467_s18 = smov %s2473_s23  ;;  %15 = sbr.rel (!%p13_p6) target bundleno = 5 (0x5), region = 73 }
 0x28b   :  { %1185 = vsyncpa [#allocation3], 1 }
 0x28c   :  { %1187 = vsyncpa [#allocation3 + $0x1], 1 }

</bundles_post_ra>
